<compile_context>
chip_gen: v7x
topology: tpu7x:2x2x1
jax: 0.10.0
libtpu: 0.0.40
codegen_flags: <defaults>
</compile_context>

<pallas_src>
import functools

import jax
import jax.numpy as jnp
from jax.experimental import pallas as pl
from jax.experimental.pallas import tpu as pltpu

_LANE = 128
_SUBLANE = 8


def _ceil_to(x, m):
    return ((x + m - 1) // m) * m


def _pad2(a, rows, cols):
    pr, pc = rows - a.shape[0], cols - a.shape[1]
    if pr == 0 and pc == 0:
        return a
    return jnp.pad(a, ((0, pr), (0, pc)))


def _largest_aligned_divisor(dim, cap, align=_LANE):
    """Largest d <= cap with d % align == 0 and dim % d == 0 (dim is a multiple of align)."""
    cap = max(align, min(cap, dim))
    d = (cap // align) * align
    while dim % d != 0:
        d -= align
    return d


# ----------------------------------------------------------------------------
# Kernels
# ----------------------------------------------------------------------------
def _gl_kernel_fullk(x_ref, wmu_ref, wsd_ref, bmu_ref, bsd_ref,
                     mu_ref, sd_ref, *, min_sd, max_sd):
    """Single-shot reduction: grid = (M/tm, N/tn); x tile carries the full K."""
    x = x_ref[...]                                            # (tm, Kp) bf16
    mu = jnp.dot(x, wmu_ref[...], preferred_element_type=jnp.float32) + bmu_ref[...]
    pre = jnp.dot(x, wsd_ref[...], preferred_element_type=jnp.float32) + bsd_ref[...]
    # Numerically stable softplus; exp/log run on the EUP slot.
    sp = jnp.maximum(pre, 0.0) + jnp.log(1.0 + jnp.exp(-jnp.abs(pre)))
    scale = jnp.minimum(sp + min_sd, max_sd)                  # AddConstant + Clamp(max=max_sd)
    mu_ref[...] = mu.astype(mu_ref.dtype)
    sd_ref[...] = scale.astype(sd_ref.dtype)


def _gl_kernel_ktiled(x_ref, wmu_ref, wsd_ref, bmu_ref, bsd_ref,
                      mu_ref, sd_ref, acc_mu, acc_sd, *, min_sd, max_sd):
    """K-tiled fallback: grid = (M/tm, N/tn, K/tk) with resident f32 accumulators."""
    k = pl.program_id(2)

    @pl.when(k == 0)
    def _init():
        # Fold the bias add into accumulator init (no zero fill + extra VPU add).
        acc_mu[...] = jnp.broadcast_to(bmu_ref[...], acc_mu.shape)
        acc_sd[...] = jnp.broadcast_to(bsd_ref[...], acc_sd.shape)

    x = x_ref[...]
    acc_mu[...] += jnp.dot(x, wmu_ref[...], preferred_element_type=jnp.float32)
    acc_sd[...] += jnp.dot(x, wsd_ref[...], preferred_element_type=jnp.float32)

    @pl.when(k == pl.num_programs(2) - 1)
    def _finalize():
        pre = acc_sd[...]
        sp = jnp.maximum(pre, 0.0) + jnp.log(1.0 + jnp.exp(-jnp.abs(pre)))
        scale = jnp.minimum(sp + min_sd, max_sd)
        mu_ref[...] = acc_mu[...].astype(mu_ref.dtype)
        sd_ref[...] = scale.astype(sd_ref.dtype)


# ----------------------------------------------------------------------------
# Wrapper
# ----------------------------------------------------------------------------
def prepare_params(w_mu, b_mu, w_sd, b_sd):
    """One-time parameter prep: pad K/N to lane multiples, cast weights to bf16.

    w_mu / w_sd: (in_features, out_features)  [already pre-transposed]
    b_mu / b_sd: (out_features,)
    """
    K, N = w_mu.shape
    Kp, Np = _ceil_to(K, _LANE), _ceil_to(N, _LANE)
    return dict(
        w_mu=_pad2(w_mu, Kp, Np).astype(jnp.bfloat16),
        w_sd=_pad2(w_sd, Kp, Np).astype(jnp.bfloat16),
        b_mu=_pad2(b_mu.reshape(1, N).astype(jnp.float32), 1, Np),
        b_sd=_pad2(b_sd.reshape(1, N).astype(jnp.float32), 1, Np),
        in_features=K,
        out_features=N,
    )


def gaussian_layer(x, params, *, min_sd=1e-8, max_sd=10.0,
                   tm_cap=512, tn_cap=512,
                   vmem_budget_bytes=14 * 1024 * 1024):
    """x: (B, in_features) -> (mu, scale), each (B, out_features)."""
    K, N = params["in_features"], params["out_features"]
    w_mu, w_sd = params["w_mu"], params["w_sd"]
    b_mu, b_sd = params["b_mu"], params["b_sd"]
    Kp, Np = w_mu.shape
    B = x.shape[0]
    assert x.shape[1] == K
    out_dtype = x.dtype
    out_bytes = jnp.dtype(out_dtype).itemsize

    # M tiling: x is padded per call, so tm is free (sublane-aligned).
    tm = min(_ceil_to(tm_cap, _SUBLANE), _ceil_to(B, _SUBLANE))
    Mp = _ceil_to(B, tm)
    grid_m = Mp // tm

    # N tiling: tn must divide the prepared Np.  On v7x (2 TCs) guarantee >= 2
    # blocks on a parallel axis when the M grid collapses to a single block.
    cap_n = tn_cap
    if grid_m == 1 and Np >= 2 * _LANE:
        cap_n = min(cap_n, Np // 2)
    tn = _largest_aligned_divisor(Np, cap_n)
    grid_n = Np // tn

    # K: prefer one full-K reduction per step (no accumulator RMW, no K axis);
    # fall back to K-tiling only if the double-buffered working set is too big.
    def _step_bytes(tk):
        # double-buffered: bf16 x tile + 2 bf16 weight tiles + 2 output tiles + biases
        return 2 * (tm * tk * 2 + 2 * tk * tn * 2 + 2 * tm * tn * out_bytes + 2 * tn * 4)

    if _step_bytes(Kp) <= vmem_budget_bytes:
        k_tiled, tk = False, Kp
    else:
        k_tiled = True
        acc_bytes = 2 * tm * tn * 4
        tk = _LANE
        d = Kp
        while d >= _LANE:
            if Kp % d == 0 and _step_bytes(d) + acc_bytes <= vmem_budget_bytes:
                tk = d
                break
            d -= _LANE

    # Per-call input prep: pad + bf16 cast x only (weights already prepared).
    xp = _pad2(x, Mp, Kp).astype(jnp.bfloat16)

    cost = pl.CostEstimate(
        flops=4 * Mp * Kp * Np,                    # two matmuls, 2*M*K*N each
        transcendentals=2 * Mp * Np,               # exp + log per sd-head element
        bytes_accessed=(grid_n * Mp * Kp * 2       # x re-streamed per N tile (bf16)
                        + grid_m * 2 * Kp * Np * 2  # both weights re-streamed per M tile
                        + 2 * Mp * Np * out_bytes), # two outputs written once
    )

    if not k_tiled:
        mu_p, sd_p = pl.pallas_call(
            functools.partial(_gl_kernel_fullk,
                              min_sd=float(min_sd), max_sd=float(max_sd)),
            out_shape=(
                jax.ShapeDtypeStruct((Mp, Np), out_dtype),
                jax.ShapeDtypeStruct((Mp, Np), out_dtype),
            ),
            grid_spec=pltpu.PrefetchScalarGridSpec(
                num_scalar_prefetch=0,
                grid=(grid_m, grid_n),
                in_specs=[
                    pl.BlockSpec((tm, Kp), lambda i, j: (i, 0)),   # x
                    pl.BlockSpec((Kp, tn), lambda i, j: (0, j)),   # w_mu
                    pl.BlockSpec((Kp, tn), lambda i, j: (0, j)),   # w_sd
                    pl.BlockSpec((1, tn), lambda i, j: (0, j)),    # b_mu
                    pl.BlockSpec((1, tn), lambda i, j: (0, j)),    # b_sd
                ],
                out_specs=(
                    pl.BlockSpec((tm, tn), lambda i, j: (i, j)),   # mu
                    pl.BlockSpec((tm, tn), lambda i, j: (i, j)),   # scale
                ),
            ),
            compiler_params=pltpu.CompilerParams(
                dimension_semantics=("parallel", "parallel")),
            cost_estimate=cost,
        )(xp, w_mu, w_sd, b_mu, b_sd)
    else:
        grid_k = Kp // tk
        mu_p, sd_p = pl.pallas_call(
            functools.partial(_gl_kernel_ktiled,
                              min_sd=float(min_sd), max_sd=float(max_sd)),
            out_shape=(
                jax.ShapeDtypeStruct((Mp, Np), out_dtype),
                jax.ShapeDtypeStruct((Mp, Np), out_dtype),
            ),
            grid_spec=pltpu.PrefetchScalarGridSpec(
                num_scalar_prefetch=0,
                grid=(grid_m, grid_n, grid_k),
                in_specs=[
                    pl.BlockSpec((tm, tk), lambda i, j, k: (i, k)),   # x
                    pl.BlockSpec((tk, tn), lambda i, j, k: (k, j)),   # w_mu
                    pl.BlockSpec((tk, tn), lambda i, j, k: (k, j)),   # w_sd
                    pl.BlockSpec((1, tn), lambda i, j, k: (0, j)),    # b_mu
                    pl.BlockSpec((1, tn), lambda i, j, k: (0, j)),    # b_sd
                ],
                out_specs=(
                    pl.BlockSpec((tm, tn), lambda i, j, k: (i, j)),   # mu
                    pl.BlockSpec((tm, tn), lambda i, j, k: (i, j)),   # scale
                ),
                scratch_shapes=[
                    pltpu.VMEM((tm, tn), jnp.float32),   # acc_mu
                    pltpu.VMEM((tm, tn), jnp.float32),   # acc_sd
                ],
            ),
            compiler_params=pltpu.CompilerParams(
                dimension_semantics=("parallel", "parallel", "arbitrary")),
            cost_estimate=cost,
        )(xp, w_mu, w_sd, b_mu, b_sd)

    if (Mp, Np) != (B, N):
        mu_p = mu_p[:B, :N]
        sd_p = sd_p[:B, :N]
    return mu_p, sd_p


def init_params(key, in_features, out_features):
    """Matches GaussianLayer.initialize():
       mu.weight    : xavier_normal_, gain = 1.0
       scale.weight : xavier_normal_, gain = calculate_gain('relu') = sqrt(2)
       biases       : default nn.Linear init, U(-1/sqrt(in), 1/sqrt(in)).
    Weights are produced directly in (in_features, out_features) layout so the
    kernel never pays a per-call HBM transpose (xavier_normal_ is symmetric in
    fan_in/fan_out, so the transposed layout has the identical distribution)."""
    k1, k2, k3, k4 = jax.random.split(key, 4)
    xavier_std = (2.0 / (in_features + out_features)) ** 0.5
    w_mu = 1.0 * xavier_std * jax.random.normal(
        k1, (in_features, out_features), dtype=jnp.float32)
    w_sd = (2.0 ** 0.5) * xavier_std * jax.random.normal(
        k2, (in_features, out_features), dtype=jnp.float32)
    bound = 1.0 / (in_features ** 0.5)
    b_mu = jax.random.uniform(k3, (out_features,), minval=-bound, maxval=bound,
                              dtype=jnp.float32)
    b_sd = jax.random.uniform(k4, (out_features,), minval=-bound, maxval=bound,
                              dtype=jnp.float32)
    return w_mu, b_mu, w_sd, b_sd


if __name__ == "__main__":
    key = jax.random.PRNGKey(0)
    k_x, k_p = jax.random.split(key)

    # Small, lane-aligned shapes consistent with the module.
    batch, in_features, out_features = 16, 512, 256
    min_sd, max_sd = 1e-8, 10.0

    x = jax.random.normal(k_x, (batch, in_features), dtype=jnp.float32)
    w_mu, b_mu, w_sd, b_sd = init_params(k_p, in_features, out_features)
    params = prepare_params(w_mu, b_mu, w_sd, b_sd)   # one-time pad + bf16 cast

    # Primary (full-K, no accumulator) path.
    mu, scale = gaussian_layer(x, params, min_sd=min_sd, max_sd=max_sd)
    jax.block_until_ready((mu, scale))

    # Pure-JAX reference using the same bf16-rounded operands, f32 accumulation.
    hi = jax.lax.Precision.HIGHEST
    xb = x.astype(jnp.bfloat16).astype(jnp.float32)
    wmu_f = w_mu.astype(jnp.bfloat16).astype(jnp.float32)
    wsd_f = w_sd.astype(jnp.bfloat16).astype(jnp.float32)
    ref_mu = jnp.dot(xb, wmu_f, precision=hi) + b_mu
    pre = jnp.dot(xb, wsd_f, precision=hi) + b_sd
    ref_scale = jnp.minimum(jax.nn.softplus(pre) + min_sd, max_sd)

    assert mu.shape == (batch, out_features) and scale.shape == (batch, out_features)
    assert jnp.allclose(mu, ref_mu, atol=5e-3, rtol=5e-3)
    assert jnp.allclose(scale, ref_scale, atol=5e-3, rtol=5e-3)
    assert bool(jnp.all(scale > 0.0)) and bool(jnp.all(scale <= max_sd))

    # Also exercise the K-tiled fallback path (a tiny VMEM budget forces tiling).
    mu2, scale2 = gaussian_layer(x, params, min_sd=min_sd, max_sd=max_sd,
                                 vmem_budget_bytes=256 * 1024)
    jax.block_until_ready((mu2, scale2))
    assert jnp.allclose(mu2, ref_mu, atol=5e-3, rtol=5e-3)
    assert jnp.allclose(scale2, ref_scale, atol=5e-3, rtol=5e-3)

    print("KERNEL_OK")
</pallas_src>

<mosaic_0001>
module attributes {stable_mosaic.version = 11 : i64} {
  func.func @_gl_kernel_fullk(%arg0: i32, %arg1: i32, %arg2: memref<16x512xbf16, #tpu.memory_space<vmem>>, %arg3: memref<512x128xbf16, #tpu.memory_space<vmem>>, %arg4: memref<512x128xbf16, #tpu.memory_space<vmem>>, %arg5: memref<1x128xf32, #tpu.memory_space<vmem>>, %arg6: memref<1x128xf32, #tpu.memory_space<vmem>>, %arg7: memref<16x128xf32, #tpu.memory_space<vmem>>, %arg8: memref<16x128xf32, #tpu.memory_space<vmem>>) attributes {dimension_semantics = [#tpu.dimension_semantics<parallel>, #tpu.dimension_semantics<parallel>], iteration_bounds = array<i64: 1, 2>, scalar_prefetch = 0 : i64, scratch_operands = 0 : i64, tpu.core_type = #tpu.core_type<tc>, window_params = [{transform_indices = @transform_0, window_bounds = array<i64: 16, 512>}, {transform_indices = @transform_1, window_bounds = array<i64: 512, 128>}, {transform_indices = @transform_2, window_bounds = array<i64: 512, 128>}, {transform_indices = @transform_3, window_bounds = array<i64: 1, 128>}, {transform_indices = @transform_4, window_bounds = array<i64: 1, 128>}, {transform_indices = @transform_5, window_bounds = array<i64: 16, 128>}, {transform_indices = @transform_6, window_bounds = array<i64: 16, 128>}]} {
    %c0 = arith.constant 0 : index
    %c0_0 = arith.constant 0 : index
    %0 = vector.load %arg2[%c0, %c0_0] : memref<16x512xbf16, #tpu.memory_space<vmem>>, vector<16x512xbf16>
    %c0_1 = arith.constant 0 : index
    %c0_2 = arith.constant 0 : index
    %1 = vector.load %arg3[%c0_1, %c0_2] : memref<512x128xbf16, #tpu.memory_space<vmem>>, vector<512x128xbf16>
    %cst = arith.constant dense<0.000000e+00> : vector<16x128xf32>
    %2 = tpu.matmul %0, %1, %cst {dimension_numbers = #tpu.dot_dimension_numbers<[1], [0], [0], [1], [0, 0, 1, 1], [], []>} : vector<16x512xbf16>, vector<512x128xbf16>, vector<16x128xf32> -> vector<16x128xf32>
    %c0_3 = arith.constant 0 : index
    %c0_4 = arith.constant 0 : index
    %3 = vector.load %arg5[%c0_3, %c0_4] : memref<1x128xf32, #tpu.memory_space<vmem>>, vector<1x128xf32>
    %4 = vector.broadcast %3 : vector<1x128xf32> to vector<16x128xf32>
    %5 = arith.addf %2, %4 : vector<16x128xf32>
    %c0_5 = arith.constant 0 : index
    %c0_6 = arith.constant 0 : index
    %6 = vector.load %arg4[%c0_5, %c0_6] : memref<512x128xbf16, #tpu.memory_space<vmem>>, vector<512x128xbf16>
    %cst_7 = arith.constant dense<0.000000e+00> : vector<16x128xf32>
    %7 = tpu.matmul %0, %6, %cst_7 {dimension_numbers = #tpu.dot_dimension_numbers<[1], [0], [0], [1], [0, 0, 1, 1], [], []>} : vector<16x512xbf16>, vector<512x128xbf16>, vector<16x128xf32> -> vector<16x128xf32>
    %c0_8 = arith.constant 0 : index
    %c0_9 = arith.constant 0 : index
    %8 = vector.load %arg6[%c0_8, %c0_9] : memref<1x128xf32, #tpu.memory_space<vmem>>, vector<1x128xf32>
    %9 = vector.broadcast %8 : vector<1x128xf32> to vector<16x128xf32>
    %10 = arith.addf %7, %9 : vector<16x128xf32>
    %cst_10 = arith.constant 0.000000e+00 : f32
    %11 = vector.broadcast %cst_10 : f32 to vector<16x128xf32>
    %12 = arith.maximumf %10, %11 : vector<16x128xf32>
    %13 = math.absf %10 : vector<16x128xf32>
    %cst_11 = arith.constant 0.000000e+00 : f32
    %14 = vector.broadcast %cst_11 : f32 to vector<16x128xf32>
    %15 = arith.subf %14, %13 : vector<16x128xf32>
    %16 = math.exp %15 : vector<16x128xf32>
    %cst_12 = arith.constant 1.000000e+00 : f32
    %17 = vector.broadcast %cst_12 : f32 to vector<16x128xf32>
    %18 = arith.addf %17, %16 : vector<16x128xf32>
    %19 = math.log %18 : vector<16x128xf32>
    %20 = arith.addf %12, %19 : vector<16x128xf32>
    %cst_13 = arith.constant 9.99999993E-9 : f32
    %21 = vector.broadcast %cst_13 : f32 to vector<16x128xf32>
    %22 = arith.addf %20, %21 : vector<16x128xf32>
    %cst_14 = arith.constant 1.000000e+01 : f32
    %23 = vector.broadcast %cst_14 : f32 to vector<16x128xf32>
    %24 = arith.minimumf %22, %23 : vector<16x128xf32>
    %c0_15 = arith.constant 0 : index
    %c0_16 = arith.constant 0 : index
    %25 = vector.load %arg7[%c0_15, %c0_16] : memref<16x128xf32, #tpu.memory_space<vmem>>, vector<16x128xf32>
    tpu.vector_store %arg7[%c0_15, %c0_16], %5 {strides = array<i32>} : memref<16x128xf32, #tpu.memory_space<vmem>>, vector<16x128xf32>,
    %c0_17 = arith.constant 0 : index
    %c0_18 = arith.constant 0 : index
    %26 = vector.load %arg8[%c0_17, %c0_18] : memref<16x128xf32, #tpu.memory_space<vmem>>, vector<16x128xf32>
    tpu.vector_store %arg8[%c0_17, %c0_18], %24 {strides = array<i32>} : memref<16x128xf32, #tpu.memory_space<vmem>>, vector<16x128xf32>,
    return
  }
  func.func @transform_0(%arg0: i32, %arg1: i32) -> (i32, i32) {
    %c0_i32 = arith.constant 0 : i32
    %c0_i32_0 = arith.constant 0 : i32
    return %arg0, %c0_i32 : i32, i32
  }
  func.func @transform_1(%arg0: i32, %arg1: i32) -> (i32, i32) {
    %c0_i32 = arith.constant 0 : i32
    %c0_i32_0 = arith.constant 0 : i32
    return %c0_i32, %arg1 : i32, i32
  }
  func.func @transform_2(%arg0: i32, %arg1: i32) -> (i32, i32) {
    %c0_i32 = arith.constant 0 : i32
    %c0_i32_0 = arith.constant 0 : i32
    return %c0_i32, %arg1 : i32, i32
  }
  func.func @transform_3(%arg0: i32, %arg1: i32) -> (i32, i32) {
    %c0_i32 = arith.constant 0 : i32
    %c0_i32_0 = arith.constant 0 : i32
    return %c0_i32, %arg1 : i32, i32
  }
  func.func @transform_4(%arg0: i32, %arg1: i32) -> (i32, i32) {
    %c0_i32 = arith.constant 0 : i32
    %c0_i32_0 = arith.constant 0 : i32
    return %c0_i32, %arg1 : i32, i32
  }
  func.func @transform_5(%arg0: i32, %arg1: i32) -> (i32, i32) {
    %c0_i32 = arith.constant 0 : i32
    return %arg0, %arg1 : i32, i32
  }
  func.func @transform_6(%arg0: i32, %arg1: i32) -> (i32, i32) {
    %c0_i32 = arith.constant 0 : i32
    return %arg0, %arg1 : i32, i32
  }
}

</mosaic_0001>

<bundles_post_ra>
// kernel: tpu_custom_call.1
= control target key start
LH: loop header
LB: loop body
LE: loop exit
PB: predicated region body
PF: predicated region fallthrough
CT: control target
= control target key end

     0   :  { %s2347_s0 = inlined_call_operand.hbm [shape: bf16[16,512], index: 0, kind: input, shape index: {}]   ;;  %s2348_s1 = inlined_call_operand.hbm [shape: bf16[512,256], index: 1, kind: input, shape index: {}]   ;;  %s2349_s2 = inlined_call_operand.hbm [shape: bf16[512,256], index: 2, kind: input, shape index: {}]   ;;  %s2350_s3 = inlined_call_operand.vmem [shape: f32[1,256], index: 3, kind: input, shape index: {}]   ;;  %s2351_s4 = inlined_call_operand.vmem [shape: f32[1,256], index: 4, kind: input, shape index: {}]   ;;  %s2352_s5 = inlined_call_operand.hbm [shape: f32[16,256], index: 5, kind: output, shape index: {0}]   ;;  %s2353_s6 = inlined_call_operand.hbm [shape: f32[16,256], index: 6, kind: output, shape index: {1}]  }
   0x1   :  { %2361 = sst [smem:[#allocation15_spill]] %s2348_s1 }
   0x2   :  { %2362 = sst [smem:[#allocation16_spill]] %s2349_s2 }
   0x3   :  { %12 = vsyncpa [#allocation3], 0 }
   0x4   :  { %13 = vsyncpa [#allocation6], 0 }
   0x5   :  { %15 = vsyncpa [#allocation6 + $0x1], 0 }
   0x6   :  { %16 = vsyncpa [#allocation4], 0 }
   0x7   :  { %18 = vsyncpa [#allocation4 + $0x1], 0 }
   0x8   :  { %19 = vsyncpa [#allocation10], 0 }
   0x9   :  { %21 = vsyncpa [#allocation10 + $0x1], 0  ;;  %s1940_s21 = smov 0   ;;  %s1942_s22 = smov 0  }
   0xa   :  { %s1944_s23 = smov 0   ;;  %s1946_s24 = smov 0  }
   0xb   :  { %s1948_s25 = smov 0   ;;  %s1950_s26 = smov 0  }
   0xc LB: > { %s36_s27 = sadd.s32 1, %s1886_s25  ;;  %s72_s28 = sadd.s32 1, %s1878_s23  ;;  %s1890_s26 = sphi %s1950_s26, %s27_s26   ;;  %s1886_s25 = sphi %s1948_s25, %s2387_s25   ;;  %s1882_s24 = sphi %s1946_s24, %s2386_s24   ;;  %s1878_s23 = sphi %s1944_s23, %s2385_s23   ;;  %s1874_s22 = sphi %s1942_s22, %s2384_s22   ;;  %s1870_s21 = sphi %s1940_s21, %s2383_s21  }
   0xd   : > { %p37_p0 = scmp.ge.s32.totalorder %s36_s27, 2  ;;  %p79_p1 = scmp.ne.s32.totalorder %s1878_s23, %s1874_s22 }
   0xe   : > { %p80_p2 = scmp.eq.s32.totalorder %s1890_s26, 0  ;;  %p1546_p5 = scmp.lt.s32.totalorder %s1890_s26, 2 }
   0xf   : > { %s2389_s27 = smov (%p37_p0, %s36_s27), 0  ;;  %s260_s30 = sand.u32 1, %s1890_s26  }
  0x10   : > { %p81_p4 = por %p80_p2, %p79_p1  ;;  %s69_s29 = ssub.s32 %s1886_s25, %s2389_s27 }
  0x11   : > { %p70_p6 = scmp.eq.s32.totalorder %s69_s29, 0  ;;  %s262_s7 = sand.u32 1, %s1878_s23  }
  0x12   : > { %s1342_s8 = sshll.u32 %s1886_s25, 6  ;;  %s1990_s10 = sshll.u32 %s262_s7, 8 }
  0x13   : > { %s1988_s9 = scalar_select %p70_p6, %s1878_s23, %s72_s28  }
  0x14   : > { %s2363_s1 = sld [smem:[#allocation15_spill]]  ;;  %p1999_p7 = pnand %p1546_p5, %p81_p4 }
  0x15   : > { %s264_s15 = scalar_lea.vmem [#allocation5], %s1990_s10  ;;  %s2006_s17 = scalar_lea.sflag [#allocation6], %s260_s30 }
  0x16   : > { %s270_s16 = sshll.u32 %s264_s15, 4  ;;  %p1686_p9 = pneg %p1999_p7  ;;  %s2004_s16 = int_to_ptr.vmem [resolvable:$true] %s270_s16 }
  0x1a   : > { %s1997_s13 = scalar_lea.hbm %s2363_s1, %s1342_s8  ;;  %s1689_s28 = scalar_lea.hbm %s2363_s1, 8192 }
  0x1b   : > { %s1684_s18 = scalar_lea.hbm %s1997_s13, 4096  ;;  %p1690_p12 = scmp.lt.u32.totalorder %s1997_s13, %s2363_s1 }
  0x1c   : > { %p1685_p8 = scmp.ne.s32.totalorder %s1997_s13, %s1684_s18  ;;  %p1691_p13 = scmp.lt.u32.totalorder %s1689_s28, %s1684_s18 }
  0x1d   : > { %p1693_p2 = scmp.lt.u32.totalorder %s1684_s18, %s1997_s13 }
  0x1e   : > { %p1687_p10 = pnand %p1686_p9, %p1685_p8  ;;  %p1692_p0 = por %p1691_p13, %p1690_p12 }
  0x20   : > { %p1688_p11 = pneg %p1687_p10  ;;  %p1694_p4 = por %p1693_p2, %p1692_p0 }
  0x22   : > { %p1695_p5 = pnand %p1694_p4, %p1688_p11 }
  0x24   : > { %1698 = shalt.err (!%p1695_p5)
}
  0x25   : > { %s1699_s30 = scalar_lea.vmem %s2004_s16, 4096  ;;  %s1892_s11 = smov [#allocation5]  }
  0x26   : > { %p1700_p6 = scmp.ne.s32.totalorder %s2004_s16, %s1699_s30  ;;  %s1704_s12 = sshll.u32 %s1892_s11, 4  ;;  %s1705_s12 = int_to_ptr.vmem [resolvable:$false] %s1704_s12 }
  0x27   : > { %s1706_s15 = scalar_lea.vmem %s1705_s12, 8192  ;;  %p1707_p3 = scmp.lt.s32.totalorder %s2004_s16, %s1705_s12 }
  0x28   : > { %p1702_p8 = pnand %p1700_p6, %p1686_p9  ;;  %p1708_p12 = scmp.lt.s32.totalorder %s1706_s15, %s1699_s30 }
  0x2a   : > { %p1703_p10 = pneg %p1702_p8  ;;  %p1709_p13 = por %p1708_p12, %p1707_p3 }
  0x2c   : > { %p1710_p0 = pnand %p1709_p13, %p1703_p10 }
  0x2e   : > { %1713 = shalt.err (!%p1710_p0)
}
  0x2f   : > { %s2354_s18 = smov 128   ;;  %s2355_s19 = smov 64  }
  0x30   : > { %s2356_s20 = smov 4   ;;  %s2365_s2 = sld [smem:[#allocation16_spill]] }
  0x31   : > { %1534 = dma.hbm_to_vmem [thread:$0]  (!%p1999_p7), %s1997_s13, 4096, %s2004_s16, %s2006_s17, %s2354_s18, %s2355_s19, %s2356_s20  }
  0x32   : > { %s284_s30 = scalar_lea.vmem [#allocation7], %s1990_s10  ;;  %s2046_s12 = sadd.s32 4294967295, %s1890_s26  }
  0x33   : > { %s290_s11 = sshll.u32 %s284_s30, 4  ;;  %s1337_s15 = sadd.s32 4294967294, %s1890_s26   ;;  %s2072_s11 = int_to_ptr.vmem [resolvable:$true] %s290_s11 }
  0x34   : > { %p85_p3 = scmp.ne.s32.totalorder %s1874_s22, %s1870_s21  ;;  %p2357_p11 = scmp.eq.s32.totalorder %s2046_s12, 0 }
  0x35   : > { %p189_p2 = scmp.eq.s32.totalorder %s2046_s12, 1  ;;  %p195_p4 = scmp.eq.s32.totalorder %s1337_s15, 1 }
  0x36   : > { %s2042_s7 = scalar_lea.hbm %s2365_s2, %s1342_s8  ;;  %p2055_p5 = por %p2357_p11, %p85_p3 }
  0x37   : > { %p1338_p6 = scmp.ge.s32.totalorder %s1890_s26, 1  ;;  %p2063_p8 = por %p189_p2, %p79_p1 }
  0x38   : > { %s2366_s13 = scalar_select %p2055_p5, 1, 0 }
  0x39   : > { %s2367_s8 = scalar_select %p2063_p8, 1, 0 }
  0x3a   : > { %p2067_p10 = por %p195_p4, %p85_p3  ;;  %p230_p12 = scmp.lt.s32.totalorder %s1890_s26, 3 }
  0x3b   : > { %s1896_s28 = smov [#allocation2]   ;;  %s1714_s30 = scalar_lea.hbm %s2042_s7, 4096 }
  0x3c   : > { %s2368_s10 = scalar_select %p2067_p10, 1, 0 }
  0x3d   : > { %p2074_p13 = pnand %p1338_p6, %p230_p12  ;;  %s246_s29 = sshll.u32 %s1896_s28, 4  ;;  %s2080_s29 = int_to_ptr.vmem [resolvable:$true] %s246_s29 }
  0x3e   : > { %p1715_p0 = scmp.ne.s32.totalorder %s2042_s7, %s1714_s30  ;;  %s1719_s19 = scalar_lea.hbm %s2365_s2, 8192 }
  0x3f   : > { %s2369_s16 = scalar_select %p2074_p13, 1, 0 }
  0x40   : > { %p1717_p3 = pnand %p1715_p0, %p1686_p9  ;;  %p1720_p4 = scmp.lt.u32.totalorder %s2042_s7, %s2365_s2 }
  0x41   : > { %p1721_p6 = scmp.lt.u32.totalorder %s1719_s19, %s1714_s30  ;;  %p1723_p11 = scmp.lt.u32.totalorder %s1714_s30, %s2042_s7 }
  0x42   : > { %p1718_p2 = pneg %p1717_p3 }
  0x43   : > { %p1722_p12 = por %p1721_p6, %p1720_p4 }
  0x45   : > { %p1724_p1 = por %p1723_p11, %p1722_p12 }
  0x47   : > { %p1725_p10 = pnand %p1724_p1, %p1718_p2 }
  0x49   : > { %1728 = shalt.err (!%p1725_p10)
}
  0x4a   : > { %s1729_s28 = scalar_lea.vmem %s2072_s11, 4096  ;;  %s1897_s18 = smov [#allocation7]  }
  0x4b   : > { %p1730_p0 = scmp.ne.s32.totalorder %s2072_s11, %s1729_s28  ;;  %s1734_s15 = sshll.u32 %s1897_s18, 4  ;;  %s1735_s15 = int_to_ptr.vmem [resolvable:$false] %s1734_s15 }
  0x4c   : > { %s1736_s1 = scalar_lea.vmem %s1735_s15, 8192  ;;  %p1737_p5 = scmp.lt.s32.totalorder %s2072_s11, %s1735_s15 }
  0x4d   : > { %p1732_p3 = pnand %p1730_p0, %p1686_p9  ;;  %p1738_p4 = scmp.lt.s32.totalorder %s1736_s1, %s1729_s28 }
  0x4f   : > { %p1733_p8 = pneg %p1732_p3  ;;  %p1739_p6 = por %p1738_p4, %p1737_p5 }
  0x51   : > { %p1740_p11 = pnand %p1739_p6, %p1733_p8 }
  0x53   : > { %1743 = shalt.err (!%p1740_p11)
}
  0x54   : > { %s2370_s19 = smov 4   ;;  %s2371_s20 = smov 64  }
  0x55   : > { %s2372_s30 = smov 128   ;;  %p2373_p9 = scmp.eq.s32.totalorder %s2046_s12, 0 }
  0x56   : > { %1537 = dma.hbm_to_vmem [thread:$0]  (!%p1999_p7), %s2042_s7, 4096, %s2072_s11, %s2006_s17, %s2372_s30, %s2371_s20, %s2370_s19  }
  0x57   : > { %p2374_p10 = pneg %p2074_p13  ;;  %s1744_s14 = scalar_lea.hbm %s2347_s0, 512 }
  0x58   : > { %p1745_p5 = scmp.ne.s32.totalorder %s2347_s0, %s1744_s14  ;;  %p1751_p12 = scmp.lt.u32.totalorder %s1744_s14, %s2347_s0 }
  0x59   : > { %p2114_p1 = pnand %p2374_p10, %p2373_p9 }
  0x5b   : > { %p1746_p8 = pneg %p2114_p1 }
  0x5d   : > { %p1747_p2 = pnand %p1746_p8, %p1745_p5 }
  0x5f   : > { %p1748_p7 = pneg %p1747_p2 }
  0x61   : > { %p1753_p0 = pnand %p1751_p12, %p1748_p7 }
  0x63   : > { %1756 = shalt.err (!%p1753_p0)
}
  0x64   : > { %s1757_s11 = scalar_lea.vmem %s2080_s29, 512  ;;  %p1765_p11 = scmp.lt.s32.totalorder %s2080_s29, %s2080_s29 }
  0x65   : > { %p1758_p3 = scmp.ne.s32.totalorder %s2080_s29, %s1757_s11  ;;  %p1766_p9 = scmp.lt.s32.totalorder %s1757_s11, %s1757_s11 }
  0x67   : > { %p1760_p4 = pnand %p1758_p3, %p1746_p8  ;;  %p1767_p10 = por %p1766_p9, %p1765_p11 }
  0x69   : > { %p1761_p6 = pneg %p1760_p4 }
  0x6b   : > { %p1768_p13 = pnand %p1767_p10, %p1761_p6 }
  0x6d   : > { %1771 = shalt.err (!%p1768_p13)
}
  0x6e   : > { %s1898_s2 = smov 256   ;;  %s1899_s19 = smov 16  }
  0x6f   : > { %1530 = dma.hbm_to_vmem [thread:$0]  (!%p2114_p1), %s2347_s0, 512, %s2080_s29, [#allocation3], %s1898_s2, %s1898_s2, %s1899_s19  }
  0x70   : > { %p2376_p5 = scmp.ne.s32.totalorder %s2369_s16, 0 }
  0x71   : > { %p2377_p8 = scmp.eq.s32.totalorder (!%p2376_p5), %s2046_s12, 0 }
  0x72   : > { %314 = sbr.rel (%p2376_p5) target bundleno = 467 (0x1d3), region = 40 }
  0x79   : > { %1853 = dma.done.wait (%p2377_p8), [#allocation3], 512   ;;  %p2378_p2 = pmov %p2377_p8 }
  0x7a   : > { %s320_s28 = sand.u32 1, %s2046_s12   ;;  %s2147_s15 = sand.u32 1, %s1874_s22  }
  0x7b   : > { %1855 = vsyncadd (%p2378_p2), [#allocation3], 4294966784  ;;  %s1347_s18 = sshll.u32 %s2147_s15, 8  ;;  %s321_s14 = scalar_lea.sflag [#allocation6], %s320_s28 }
  0x7c   : > { %s2152_s29 = scalar_lea.vmem [#allocation5], %s1347_s18  ;;  %p2379_p13 = scmp.ne.s32.totalorder %s2366_s13, 0 }
  0x7e   : > { %1857 = dma.done.wait (%p2379_p13), %s321_s14, 8192  }
  0x7f   : > { %1859 = vsyncadd (%p2379_p13), %s321_s14, 4294959104  ;;  %v1606_v0 = vld [vmem:[%s2152_s29 + $0x40] sm:$0xff]   ;;  %v1610_v4 = vld [vmem:[%s2152_s29 + $0x48] sm:$0xff]   ;;  %s2196_s12 = scalar_lea.vmem [#allocation7], %s1347_s18  ;;  %p379_p1 = scmp.lt.s32.totalorder %s1882_s24, 1 }
  0x80   : > { %v1607_v1 = vld [vmem:[%s2152_s29 + $0xc0] sm:$0xff]   ;;  %1427 = vmatprep.subr.bf16.mxu0 %v1606_v0  ;;  %v1611_v5 = vld [vmem:[%s2152_s29 + $0xc8] sm:$0xff]   ;;  %v1614_v8 = vld [vmem:[%s2152_s29 + $0x50] sm:$0xff]   ;;  %s1349_s7 = sshll.u32 %s2147_s15, 4  ;;  %s1423_s19 = sshll.u32 %s1882_s24, 7 }
  0x81   : > { %v1608_v2 = vld [vmem:[%s2152_s29] sm:$0xff]   ;;  %1449 = vmatprep.subr.bf16.mxu1 %v1607_v1  ;;  %v1612_v6 = vld [vmem:[%s2152_s29 + $0x8] sm:$0xff]   ;;  %v1615_v9 = vld [vmem:[%s2152_s29 + $0xd0] sm:$0xff]   ;;  %s2236_s13 = scalar_select %p379_p1, %s1882_s24, 1 }
  0x82   : > { %v1609_v3 = vld [vmem:[%s2152_s29 + $0x80] sm:$0xff]   ;;  %1428 = vmatpush3.bf16.msra.mxu0 %v1608_v2  ;;  %v1613_v7 = vld [vmem:[%s2152_s29 + $0x88] sm:$0xff]   ;;  %v1616_v10 = vld [vmem:[%s2152_s29 + $0x10] sm:$0xff]   ;;  %s370_s11 = scalar_lea.vmem [#allocation8], %s1349_s7  ;;  %s2253_s28 = scalar_lea.hbm %s2352_s5, %s1423_s19 }
  0x83   : > { %1450 = vmatpush3.bf16.msra.mxu1 %v1609_v3  ;;  %1429 = vmatprep.subr.bf16.mxu0 %v1610_v4  ;;  %v1617_v11 = vld [vmem:[%s2152_s29 + $0x90] sm:$0xff]   ;;  %v1618_v12 = vld [vmem:[%s2152_s29 + $0x58] sm:$0xff]   ;;  %v1622_v16 = vld [vmem:[%s2152_s29 + $0x60] sm:$0xff]   ;;  %s381_s17 = scalar_lea.vmem %s2350_s3, %s2236_s13  ;;  %s1149_s2 = sshll.u32 %s370_s11, 4  ;;  %s2246_s2 = int_to_ptr.vmem [resolvable:$true] %s1149_s2 }
  0x84   : > { %1451 = vmatprep.subr.bf16.mxu1 %v1611_v5  ;;  %v1619_v13 = vld [vmem:[%s2152_s29 + $0xd8] sm:$0xff]   ;;  %v1623_v17 = vld [vmem:[%s2152_s29 + $0xe0] sm:$0xff]   ;;  %v1626_v20 = vld [vmem:[%s2152_s29 + $0x68] sm:$0xff]   ;;  %s1129_s18 = scalar_lea.sflag [#allocation4], %s2147_s15  ;;  %s1772_s14 = scalar_lea.vmem %s2246_s2, 256 }
  0x85   : > { %v1620_v14 = vld [vmem:[%s2152_s29 + $0x18] sm:$0xff]   ;;  %v1624_v18 = vld [vmem:[%s2152_s29 + $0x20] sm:$0xff]   ;;  %v1627_v21 = vld [vmem:[%s2152_s29 + $0xe8] sm:$0xff]   ;;  %p1773_p7 = scmp.ne.s32.totalorder %s2246_s2, %s1772_s14  ;;  %p2380_p12 = scmp.ne.s32.totalorder %s2367_s8, 0 }
  0x86   : > { %1430 = vmatpush3.bf16.msra.mxu0 %v1612_v6  ;;  %v1621_v15 = vld [vmem:[%s2152_s29 + $0x98] sm:$0xff]   ;;  %v1625_v19 = vld [vmem:[%s2152_s29 + $0xa0] sm:$0xff]   ;;  %v1628_v22 = vld [vmem:[%s2152_s29 + $0x28] sm:$0xff]  }
  0x87   : > { %1452 = vmatpush3.bf16.msra.mxu1 %v1613_v7  ;;  %1431 = vmatprep.subr.bf16.mxu0 %v1614_v8  ;;  %v1629_v23 = vld [vmem:[%s2152_s29 + $0xa8] sm:$0xff]   ;;  %v1630_v24 = vld [vmem:[%s2152_s29 + $0x70] sm:$0xff]   ;;  %v1634_v28 = vld [vmem:[%s2152_s29 + $0x78] sm:$0xff]   ;;  %p1774_p0 = pnand %p1773_p7, %p2380_p12 }
  0x88   : > { %1453 = vmatprep.subr.bf16.mxu1 %v1615_v9  ;;  %v1631_v25 = vld [vmem:[%s2152_s29 + $0xf0] sm:$0xff]   ;;  %v1635_v29 = vld [vmem:[%s2152_s29 + $0xf8] sm:$0xff]   ;;  %v1644_v36 = vld [vmem:[%s2196_s12 + $0x40] sm:$0xff]  }
  0x89   : > { %v1632_v26 = vld [vmem:[%s2152_s29 + $0x30] sm:$0xff]   ;;  %v1636_v30 = vld [vmem:[%s2152_s29 + $0x38] sm:$0xff]   ;;  %v1645_v37 = vld [vmem:[%s2196_s12 + $0xc0] sm:$0xff]   ;;  %p1775_p3 = pneg %p1774_p0 }
  0x8a   : > { %1432 = vmatpush3.bf16.msra.mxu0 %v1616_v10  ;;  %v1633_v27 = vld [vmem:[%s2152_s29 + $0xb0] sm:$0xff]   ;;  %v1637_v31 = vld [vmem:[%s2152_s29 + $0xb8] sm:$0xff]   ;;  %v1646_v38 = vld [vmem:[%s2196_s12] sm:$0xff]   ;;  %s1900_s29 = smov [#allocation8]  }
  0x8b   : > { %1454 = vmatpush3.bf16.msra.mxu1 %v1617_v11  ;;  %1433 = vmatprep.subr.bf16.mxu0 %v1618_v12  ;;  %v2190_v32 = vld [vmem:[#allocation2] ss:$16 sps:$4 sm:$0xff]   ;;  %v1640_v33 = vld [vmem:[#allocation2 + $0x4] ss:$16 sps:$4 sm:$0xff]   ;;  %v2192_v34 = vld [vmem:[#allocation2 + $0x8] ss:$16 sps:$4 sm:$0xff]  }
  0x8c   : > { %1455 = vmatprep.subr.bf16.mxu1 %v1619_v13  ;;  %v1643_v35 = vld [vmem:[#allocation2 + $0xc] ss:$16 sps:$4 sm:$0xff]   ;;  %707 = vmatprep.mubr.bf16.mxu0 %v1640_v33  ;;  %v1647_v39 = vld [vmem:[%s2196_s12 + $0x80] sm:$0xff]   ;;  %v1652_v44 = vld [vmem:[%s2196_s12 + $0x50] sm:$0xff]  }
  0x8d   : > { %748 = vmatprep.mubr.bf16.mxu1 %v1643_v35  ;;  %v1648_v40 = vld [vmem:[%s2196_s12 + $0x48] sm:$0xff]   ;;  %v1653_v45 = vld [vmem:[%s2196_s12 + $0xd0] sm:$0xff]   ;;  %v1656_v48 = vld [vmem:[%s2196_s12 + $0x58] sm:$0xff]  }
  0x8e   : > { %1434 = vmatpush3.bf16.msra.mxu0 %v1620_v14  ;;  %v1649_v41 = vld [vmem:[%s2196_s12 + $0xc8] sm:$0xff]   ;;  %v1654_v46 = vld [vmem:[%s2196_s12 + $0x10] sm:$0xff]   ;;  %v1657_v49 = vld [vmem:[%s2196_s12 + $0xd8] sm:$0xff]  }
  0x8f   : > { %1456 = vmatpush3.bf16.msra.mxu1 %v1621_v15  ;;  %1435 = vmatprep.subr.bf16.mxu0 %v1622_v16  ;;  %v1650_v42 = vld [vmem:[%s2196_s12 + $0x8] sm:$0xff]   ;;  %v1655_v47 = vld [vmem:[%s2196_s12 + $0x90] sm:$0xff]   ;;  %v1658_v50 = vld [vmem:[%s2196_s12 + $0x18] sm:$0xff]  }
  0x90   : > { %1457 = vmatprep.subr.bf16.mxu1 %v1623_v17  ;;  %v1651_v43 = vld [vmem:[%s2196_s12 + $0x88] sm:$0xff]   ;;  %v1659_v51 = vld [vmem:[%s2196_s12 + $0x98] sm:$0xff]   ;;  %v1660_v52 = vld [vmem:[%s2196_s12 + $0x60] sm:$0xff]  }
  0x91   : > { %v1661_v53 = vld [vmem:[%s2196_s12 + $0xe0] sm:$0xff]   ;;  %v1664_v56 = vld [vmem:[%s2196_s12 + $0x68] sm:$0xff]   ;;  %v1668_v60 = vld [vmem:[%s2196_s12 + $0x70] sm:$0xff]  }
  0x92   : > { %1436 = vmatpush3.bf16.msra.mxu0 %v1624_v18  ;;  %v1662_v54 = vld [vmem:[%s2196_s12 + $0x20] sm:$0xff]   ;;  %v1665_v57 = vld [vmem:[%s2196_s12 + $0xe8] sm:$0xff]   ;;  %v1669_v61 = vld [vmem:[%s2196_s12 + $0xf0] sm:$0xff]  }
  0x93   : > { %1458 = vmatpush3.bf16.msra.mxu1 %v1625_v19  ;;  %1437 = vmatprep.subr.bf16.mxu0 %v1626_v20  ;;  %v1663_v55 = vld [vmem:[%s2196_s12 + $0xa0] sm:$0xff]   ;;  %v1666_v58 = vld [vmem:[%s2196_s12 + $0x28] sm:$0xff]   ;;  %v1670_v62 = vld [vmem:[%s2196_s12 + $0x30] sm:$0xff]  }
  0x94   : > { %1459 = vmatprep.subr.bf16.mxu1 %v1627_v21  ;;  %v1667_v59 = vld [vmem:[%s2196_s12 + $0xa8] sm:$0xff]   ;;  %v1671_v63 = vld [vmem:[%s2196_s12 + $0xb0] sm:$0xff]   ;;  %v1672_v0 = vld [vmem:[%s2196_s12 + $0x78] sm:$0xff]  }
  0x95   : > { %v1673_v1 = vld [vmem:[%s2196_s12 + $0xf8] sm:$0xff]   ;;  %v1351_v6 = vld [vmem:[%s381_s17] ss:$0 sm:$0xff] }
  0x96   : > { %1438 = vmatpush3.bf16.msra.mxu0 %v1628_v22  ;;  %v1674_v2 = vld [vmem:[%s2196_s12 + $0x38] sm:$0xff]  }
  0x97   : > { %1460 = vmatpush3.bf16.msra.mxu1 %v1629_v23  ;;  %1439 = vmatprep.subr.bf16.mxu0 %v1630_v24  ;;  %v1675_v3 = vld [vmem:[%s2196_s12 + $0xb8] sm:$0xff]   ;;  %s1776_s12 = sshll.u32 %s1900_s29, 4  ;;  %s1777_s12 = int_to_ptr.vmem [resolvable:$false] %s1776_s12 }
  0x98   : > { %1461 = vmatprep.subr.bf16.mxu1 %v1631_v25  ;;  %s1778_s16 = scalar_lea.vmem %s1777_s12, 512  ;;  %p1779_p4 = scmp.lt.s32.totalorder %s2246_s2, %s1777_s12 }
  0x99   : > { %p1780_p6 = scmp.lt.s32.totalorder %s1778_s16, %s1772_s14 }
  0x9a   : > { %1440 = vmatpush3.bf16.msra.mxu0 %v1632_v26 }
  0x9b   : > { %1462 = vmatpush3.bf16.msra.mxu1 %v1633_v27  ;;  %1441 = vmatprep.subr.bf16.mxu0 %v1634_v28  ;;  %p1781_p11 = por %p1780_p6, %p1779_p4 }
  0x9c   : > { %1463 = vmatprep.subr.bf16.mxu1 %v1635_v29 }
  0x9d   : > { %p1782_p9 = pnand %p1781_p11, %p1775_p3 }
  0x9e   : > { %1442 = vmatpush3.bf16.msra.mxu0 %v1636_v30 }
  0x9f   : > { %1464 = vmatpush3.bf16.msra.mxu1 %v1637_v31  ;;  %1471 = vmatprep.subr.bf16.mxu0 %v1644_v36 }
  0xa0   : > { %1493 = vmatprep.subr.bf16.mxu1 %v1645_v37 }
  0xa1   : > { %708 = vmatmul.mubr.bf16.vlgmr.msra.gmra.mrb[0].mxu0 %v2190_v32 }
  0xa2   : > { %749 = vmatmul.mubr.bf16.vlgmr.msra.gmra.mrb[0].mxu1 %v2192_v34  ;;  %1052 = vmatprep.mubr.bf16.mxu0 %v1640_v33 }
  0xa3   : > { %1472 = vmatpush3.bf16.msra.mxu0 %v1646_v38  ;;  %1093 = vmatprep.mubr.bf16.mxu1 %v1643_v35 }
  0xa4   : > { %1494 = vmatpush3.bf16.msra.mxu1 %v1647_v39  ;;  %1473 = vmatprep.subr.bf16.mxu0 %v1648_v40 }
  0xa5   : > { %1495 = vmatprep.subr.bf16.mxu1 %v1649_v41 }
  0xa7   : > { %1474 = vmatpush3.bf16.msra.mxu0 %v1650_v42 }
  0xa8   : > { %1496 = vmatpush3.bf16.msra.mxu1 %v1651_v43  ;;  %1475 = vmatprep.subr.bf16.mxu0 %v1652_v44 }
  0xa9   : > { %1497 = vmatprep.subr.bf16.mxu1 %v1653_v45 }
  0xab   : > { %1476 = vmatpush3.bf16.msra.mxu0 %v1654_v46 }
  0xac   : > { %1498 = vmatpush3.bf16.msra.mxu1 %v1655_v47  ;;  %1477 = vmatprep.subr.bf16.mxu0 %v1656_v48 }
  0xad   : > { %1499 = vmatprep.subr.bf16.mxu1 %v1657_v49 }
  0xaf   : > { %1478 = vmatpush3.bf16.msra.mxu0 %v1658_v50 }
  0xb0   : > { %1500 = vmatpush3.bf16.msra.mxu1 %v1659_v51  ;;  %1479 = vmatprep.subr.bf16.mxu0 %v1660_v52 }
  0xb1   : > { %1501 = vmatprep.subr.bf16.mxu1 %v1661_v53 }
  0xb3   : > { %1480 = vmatpush3.bf16.msra.mxu0 %v1662_v54 }
  0xb4   : > { %1502 = vmatpush3.bf16.msra.mxu1 %v1663_v55  ;;  %1481 = vmatprep.subr.bf16.mxu0 %v1664_v56 }
  0xb5   : > { %1503 = vmatprep.subr.bf16.mxu1 %v1665_v57 }
  0xb7   : > { %1482 = vmatpush3.bf16.msra.mxu0 %v1666_v58 }
  0xb8   : > { %1504 = vmatpush3.bf16.msra.mxu1 %v1667_v59  ;;  %1483 = vmatprep.subr.bf16.mxu0 %v1668_v60 }
  0xb9   : > { %1505 = vmatprep.subr.bf16.mxu1 %v1669_v61 }
  0xbb   : > { %1484 = vmatpush3.bf16.msra.mxu0 %v1670_v62 }
  0xbc   : > { %1506 = vmatpush3.bf16.msra.mxu1 %v1671_v63  ;;  %1485 = vmatprep.subr.bf16.mxu0 %v1672_v0 }
  0xbd   : > { %1507 = vmatprep.subr.bf16.mxu1 %v1673_v1 }
  0xbf   : > { %1486 = vmatpush3.bf16.msra.mxu0 %v1674_v2 }
  0xc0   : > { %1508 = vmatpush3.bf16.msra.mxu1 %v1675_v3 }
  0xc2   : > { %1053 = vmatmul.mubr.bf16.vlgmr.msra.gmra.mrb[4].mxu0 %v2190_v32 }
  0xc3   : > { %1094 = vmatmul.mubr.bf16.vlgmr.msra.gmra.mrb[4].mxu1 %v2192_v34 }
 0x174   : > { %v1443_v4 = vpop.f32.mrb[0].mxu0 }
 0x175   : > { %v1465_v5 = vpop.f32.mrb[0].mxu1  ;;  %v1444_v7 = vpop.f32.mrb[1].mxu0 }
 0x176   : > { %v1445_v8 = vadd.f32 %v1444_v7, %v1443_v4  ;;  %v1466_v9 = vpop.f32.mrb[1].mxu1  ;;  %v1446_v10 = vpop.f32.mrb[2].mxu0 }
 0x177   : > { %v1467_v11 = vadd.f32 %v1466_v9, %v1465_v5  ;;  %v1468_v12 = vpop.f32.mrb[2].mxu1  ;;  %v1447_v13 = vpop.f32.mrb[3].mxu0 }
 0x178   : > { %v710_v14 = vadd.f32 %v1445_v8, %v1351_v6  ;;  %v1448_v15 = vadd.f32 %v1447_v13, %v1446_v10  ;;  %v1469_v16 = vpop.f32.mrb[3].mxu1 }
 0x179   : > { %v1470_v17 = vadd.f32 %v1469_v16, %v1468_v12 }
 0x17a   : > { %v751_v18 = vadd.f32 %v1467_v11, %v710_v14  ;;  %v713_v19 = vadd.f32 %v1448_v15, %v1351_v6 }
 0x17c   : > { %1124 = vst [vmem:[%s370_s11] sm:$0xff] %v751_v18  ;;  %v754_v20 = vadd.f32 %v1470_v17, %v713_v19 }
 0x17e   : > { %1125 = vst [vmem:[%s370_s11 + $0x8] sm:$0xff] %v754_v20 }
 0x17f   : > { %1785 = shalt.err (!%p1782_p9)
}
 0x180   : > { %s1786_s1 = scalar_lea.hbm %s2253_s28, 256  ;;  %s1790_s20 = scalar_lea.hbm %s2352_s5, 512 }
 0x181   : > { %p1787_p10 = scmp.ne.s32.totalorder %s2253_s28, %s1786_s1  ;;  %p1791_p2 = scmp.lt.u32.totalorder %s2253_s28, %s2352_s5 }
 0x182   : > { %p1792_p13 = scmp.lt.u32.totalorder %s1790_s20, %s1786_s1  ;;  %p1794_p7 = scmp.lt.u32.totalorder %s1786_s1, %s2253_s28 }
 0x183   : > { %p1788_p5 = pnand %p1787_p10, %p2380_p12 }
 0x184   : > { %p1793_p1 = por %p1792_p13, %p1791_p2 }
 0x185   : > { %p1789_p8 = pneg %p1788_p5 }
 0x186   : > { %p1795_p0 = por %p1794_p7, %p1793_p1 }
 0x188   : > { %p1796_p3 = pnand %p1795_p0, %p1789_p8 }
 0x18a   : > { %1799 = shalt.err (!%p1796_p3)
}
 0x18b   : > { %s1901_s14 = smov 128   ;;  %s1902_s12 = smov 256  }
 0x18c   : > { %s1903_s16 = smov 8   ;;  %s384_s1 = scalar_lea.vmem %s2351_s4, %s2236_s13 }
 0x18d   : > { %1523 = dma.vmem_to_hbm [thread:$0]  (%p2380_p12), %s2246_s2, 256, %s2253_s28, %s1129_s18, %s1901_s14, %s1902_s12, %s1903_s16  }
 0x18e   : > { %v1388_v23 = vld [vmem:[%s384_s1] ss:$0 sm:$0xff]  ;;  %s377_s13 = scalar_lea.vmem [#allocation9], %s1349_s7  ;;  %s2295_s20 = scalar_lea.hbm %s2353_s6, %s1423_s19 }
 0x18f   : > { %s1167_s2 = sshll.u32 %s377_s13, 4  ;;  %s1134_s7 = scalar_lea.sflag [#allocation10], %s2147_s15  ;;  %s2288_s2 = int_to_ptr.vmem [resolvable:$true] %s1167_s2 }
 0x190   : > { %s1800_s30 = scalar_lea.vmem %s2288_s2, 256  ;;  %s1904_s29 = smov [#allocation9]  }
 0x191   : > { %p1801_p4 = scmp.ne.s32.totalorder %s2288_s2, %s1800_s30  ;;  %s1804_s17 = sshll.u32 %s1904_s29, 4  ;;  %s1805_s17 = int_to_ptr.vmem [resolvable:$false] %s1804_s17 }
 0x192   : > { %s1806_s11 = scalar_lea.vmem %s1805_s17, 512  ;;  %p1807_p9 = scmp.lt.s32.totalorder %s2288_s2, %s1805_s17 }
 0x193   : > { %p1802_p6 = pnand %p1801_p4, %p2380_p12  ;;  %p1808_p10 = scmp.lt.s32.totalorder %s1806_s11, %s1800_s30 }
 0x195   : > { %v1487_v21 = vpop.f32.mrb[4].mxu0  ;;  %p1803_p11 = pneg %p1802_p6  ;;  %p1809_p5 = por %p1808_p10, %p1807_p9 }
 0x196   : > { %v1509_v22 = vpop.f32.mrb[4].mxu1  ;;  %v1488_v24 = vpop.f32.mrb[5].mxu0 }
 0x197   : > { %v1489_v25 = vadd.f32 %v1488_v24, %v1487_v21  ;;  %v1510_v26 = vpop.f32.mrb[5].mxu1  ;;  %v1490_v27 = vpop.f32.mrb[6].mxu0  ;;  %p1810_p8 = pnand %p1809_p5, %p1803_p11 }
 0x198   : > { %v1511_v28 = vadd.f32 %v1510_v26, %v1509_v22  ;;  %v1512_v29 = vpop.f32.mrb[6].mxu1  ;;  %v1491_v30 = vpop.f32.mrb[7].mxu0 }
 0x199   : > { %v1055_v31 = vadd.f32 %v1489_v25, %v1388_v23  ;;  %v1492_v32 = vadd.f32 %v1491_v30, %v1490_v27  ;;  %v1513_v33 = vpop.f32.mrb[7].mxu1 }
 0x19a   : > { %v1514_v34 = vadd.f32 %v1513_v33, %v1512_v29 }
 0x19b   : > { %v1096_v35 = vadd.f32 %v1511_v28, %v1055_v31  ;;  %v1058_v36 = vadd.f32 %v1492_v32, %v1388_v23 }
 0x19d   : > { %v1104_v37 = vand.u32 2147483647, %v1096_v35  ;;  %v1099_v38 = vadd.f32 %v1514_v34, %v1058_v36  ;;  %v1102_v49 = vmax.f32 %v1096_v35, 0.0 }
 0x19f   : > { %v1106_v39 = vsub.f32 0.0, %v1104_v37  ;;  %v1105_v40 = vand.u32 2147483647, %v1099_v38  ;;  %v1103_v53 = vmax.f32 %v1099_v38, 0.0 }
 0x1a1   : > { %v1108_v41 = vmul.f32 1.442695, %v1106_v39  ;;  %v1107_v42 = vsub.f32 0.0, %v1105_v40 }
 0x1a3   : > { %1676 = vpow2.f32 %v1108_v41  ;;  %v1110_v43 = vmul.f32 1.442695, %v1107_v42 }
 0x1a5   : > { %1678 = vpow2.f32 %v1110_v43 }
 0x1ad   : > { %v1677_v44 = vpop.eup %1676 }
 0x1ae   : > { %v1112_v45 = vadd.f32 1.0, %v1677_v44 }
 0x1af   : > { %v1679_v46 = vpop.eup %1678 }
 0x1b0   : > { %1680 = vlog2.f32 %v1112_v45  ;;  %v1113_v47 = vadd.f32 1.0, %v1679_v46 }
 0x1b2   : > { %1682 = vlog2.f32 %v1113_v47 }
 0x1ba   : > { %v1681_v48 = vpop.eup %1680 }
 0x1bb   : > { %v1115_v50 = vmul.f32 0.6931472, %v1681_v48 }
 0x1bc   : > { %v1683_v51 = vpop.eup %1682 }
 0x1bd   : > { %v1118_v52 = vadd.f32 %v1115_v50, %v1102_v49  ;;  %v1117_v54 = vmul.f32 0.6931472, %v1683_v51 }
 0x1bf   : > { %v1120_v55 = vadd.f32 1e-08, %v1118_v52  ;;  %v1119_v56 = vadd.f32 %v1117_v54, %v1103_v53 }
 0x1c1   : > { %v1122_v57 = vmin.f32 %v1120_v55, 10.0  ;;  %v1121_v58 = vadd.f32 1e-08, %v1119_v56 }
 0x1c3   : > { %1126 = vst [vmem:[%s377_s13] sm:$0xff] %v1122_v57  ;;  %v1123_v59 = vmin.f32 %v1121_v58, 10.0 }
 0x1c5   : > { %1127 = vst [vmem:[%s377_s13 + $0x8] sm:$0xff] %v1123_v59 }
 0x1c6   : > { %1813 = shalt.err (!%p1810_p8)
}
 0x1c7   : > { %s1814_s24 = scalar_lea.hbm %s2295_s20, 256  ;;  %s1818_s13 = scalar_lea.hbm %s2353_s6, 512 }
 0x1c8   : > { %p1815_p2 = scmp.ne.s32.totalorder %s2295_s20, %s1814_s24  ;;  %p1819_p7 = scmp.lt.u32.totalorder %s2295_s20, %s2353_s6 }
 0x1c9   : > { %p1820_p0 = scmp.lt.u32.totalorder %s1818_s13, %s1814_s24  ;;  %p1822_p4 = scmp.lt.u32.totalorder %s1814_s24, %s2295_s20 }
 0x1ca   : > { %p1816_p13 = pnand %p1815_p2, %p2380_p12 }
 0x1cb   : > { %p1821_p3 = por %p1820_p0, %p1819_p7 }
 0x1cc   : > { %p1817_p1 = pneg %p1816_p13 }
 0x1cd   : > { %p1823_p6 = por %p1822_p4, %p1821_p3 }
 0x1cf   : > { %p1824_p11 = pnand %p1823_p6, %p1817_p1 }
 0x1d1   : > { %1827 = shalt.err (!%p1824_p11)
}
 0x1d2   : > { %1524 = dma.vmem_to_hbm [thread:$0]  (%p2380_p12), %s2288_s2, 256, %s2295_s20, %s1134_s7, %s1901_s14, %s1902_s12, %s1903_s16  }
 0x1d3 PF: > { %s1182_s30 = sand.u32 1, %s1870_s21   ;;  %p2381_p9 = scmp.ne.s32.totalorder %s2368_s10, 0 }
 0x1d4   : > { %p2382_p10 = scmp.ge.s32.totalorder %s1890_s26, 2  ;;  %s1183_s29 = scalar_lea.sflag [#allocation4], %s1182_s30 }
 0x1d6   : > { %p1539_p5 = pnand %p2382_p10, %p2381_p9 }
 0x1d8   : > { %1861 = dma.done.wait (!%p1539_p5), %s1183_s29, 256  }
 0x1d9   : > { %1863 = vsyncadd (!%p1539_p5), %s1183_s29, 4294967040  ;;  %s1192_s8 = scalar_lea.sflag [#allocation10], %s1182_s30 }
 0x1da   : > { %1865 = dma.done.wait (!%p1539_p5), %s1192_s8, 256  }
 0x1db   : > { %1867 = vsyncadd (!%p1539_p5), %s1192_s8, 4294967040  ;;  %s27_s26 = sadd.s32 1, %s1890_s26   ;;  %s2383_s21 = smov %s1874_s22 }
 0x1dc   : > { %p24_p8 = scmp.ge.s32.totalorder %s27_s26, 4   ;;  %s2384_s22 = smov %s1878_s23 }
 0x1dd   : > { %s2385_s23 = smov %s1988_s9  ;;  %s2386_s24 = smov %s1886_s25 }
 0x1de   : > { %s2387_s25 = smov %s2389_s27  ;;  %26 = sbr.rel (!%p24_p8) target bundleno = 12 (0xc), region = 125 }
 0x1e5   :  { %1197 = vsyncpa [#allocation3], 1 }
 0x1e6   :  { %1199 = vsyncpa [#allocation3 + $0x1], 1 }
 0x1e7   :  { %1200 = vsyncpa [#allocation6], 1 }
 0x1e8   :  { %1202 = vsyncpa [#allocation6 + $0x1], 1 }
 0x1e9   :  { %1203 = vsyncpa [#allocation4], 1 }
 0x1ea   :  { %1205 = vsyncpa [#allocation4 + $0x1], 1 }
 0x1eb   :  { %1206 = vsyncpa [#allocation10], 1 }
 0x1ec   :  { %1208 = vsyncpa [#allocation10 + $0x1], 1 }

</bundles_post_ra>
